<compile_context>
chip_gen: v7x
topology: tpu7x:2x2x1
jax: 0.10.0
libtpu: 0.0.40
codegen_flags: <defaults>
</compile_context>

<pallas_src>
import functools

import jax
import jax.numpy as jnp
from jax import lax
from jax.experimental import pallas as pl
from jax.experimental.pallas import tpu as pltpu

EPS = 1e-5
CHUNK = 512                      # output-pixel columns per inner conv step
VMEM_LIMIT = 32 * 1024 * 1024


# ---------------------------------------------------------------------------
# Linear: y = x @ W.T + b, weights streamed in bf16, f32 accumulate.
# ---------------------------------------------------------------------------
def _linear_kernel(x_ref, w_ref, b_ref, o_ref):
    x = x_ref[...].astype(jnp.bfloat16)
    o_ref[...] = (
        jnp.dot(x, w_ref[...], preferred_element_type=jnp.float32) + b_ref[...]
    )


def linear(x, w_t, b, *, tn=8192):
    m, k = x.shape
    _, n = w_t.shape
    assert n % tn == 0
    return pl.pallas_call(
        _linear_kernel,
        out_shape=jax.ShapeDtypeStruct((m, n), jnp.float32),
        grid=(n // tn,),
        in_specs=[
            pl.BlockSpec((m, k), lambda j: (0, 0)),
            pl.BlockSpec((k, tn), lambda j: (0, j)),
            pl.BlockSpec((1, tn), lambda j: (0, j)),
        ],
        out_specs=pl.BlockSpec((m, tn), lambda j: (0, j)),
        compiler_params=pltpu.CompilerParams(
            dimension_semantics=("parallel",),
            vmem_limit_bytes=VMEM_LIMIT,
        ),
    )(x, w_t, b)


# ---------------------------------------------------------------------------
# Fused 2x-nearest-upsample + 3x3/s1/p1 conv.
#
# A 3x3 conv on the 2x-nearest-upsampled image equals, for each output-pixel
# parity class (py, px) in {0,1}^2, a 2x2 conv on the zero-padded SOURCE image:
#   out[2a+py, 2b+px] = sum_{ry,rx in {0,1}} Wc[(py,px),(ry,rx)] @ P[a+py+ry, b+px+rx]
# with Wc = parity-dependent partial sums of the original 3x3 weights.
# The kernel also fuses bias, optional tanh and the next BatchNorm's batch
# statistics (junk width-pad columns masked out of the stats).
# ---------------------------------------------------------------------------
_UP_A = jnp.array([[[1.0, 0.0, 0.0], [0.0, 1.0, 1.0]],     # even output row/col
                   [[1.0, 1.0, 0.0], [0.0, 0.0, 1.0]]],    # odd output row/col
                  jnp.float32)


def fuse_upsample_conv_weights(w):
    """(Cout, Cin, 3, 3) -> (16, Cout, Cin); index = (py*2+px)*4 + (ry*2+rx)."""
    wf = w.astype(jnp.float32)
    blocks = []
    for py in range(2):
        for px in range(2):
            c = jnp.einsum("rd,se,oide->rsoi", _UP_A[py], _UP_A[px], wf)
            blocks.append(c.reshape(4, w.shape[0], w.shape[1]))
    return jnp.concatenate(blocks, axis=0)


def _upconv_kernel(x_ref, w_ref, b_ref, o_ref, sum_ref, sq_ref,
                   *, wps, ws, use_tanh):
    j = pl.program_id(1)

    @pl.when(j == 0)
    def _():
        sum_ref[...] = jnp.zeros_like(sum_ref)
        sq_ref[...] = jnp.zeros_like(sq_ref)

    cout = b_ref.shape[0]
    r = o_ref.shape[-1]                                       # trs * wps
    bias = b_ref[...]                                         # (Cout, 1)
    s_acc = jnp.zeros((cout, 1), jnp.float32)
    q_acc = jnp.zeros((cout, 1), jnp.float32)
    for cls in range(4):                                      # parity classes
        py, px = cls // 2, cls % 2
        for s in range(0, r, CHUNK):                          # static chunk loop
            ch = min(CHUNK, r - s)
            acc = jnp.zeros((cout, ch), jnp.float32)
            for t in range(4):                                # unrolled 2x2 taps
                ry, rx = t // 2, t % 2
                off = s + (py + ry) * wps + (px + rx)
                acc = acc + jnp.dot(
                    w_ref[cls * 4 + t], x_ref[:, off:off + ch],
                    preferred_element_type=jnp.float32)
            y = acc + bias
            if use_tanh:
                y = jnp.tanh(y)
            o_ref[cls, :, s:s + ch] = y.astype(o_ref.dtype)
            # masked per-channel batch statistics (exclude width-pad junk cols)
            col = lax.broadcasted_iota(jnp.int32, (1, ch), 1) + s
            valid = (col % wps) < ws
            s_acc = s_acc + jnp.sum(jnp.where(valid, y, 0.0), axis=1,
                                    keepdims=True)
            q_acc = q_acc + jnp.sum(jnp.where(valid, y * y, 0.0), axis=1,
                                    keepdims=True)
    sum_ref[...] += s_acc
    sq_ref[...] += q_acc


def upconv3x3_fused(x_blocks, w_fused, b, *, wps, ws, use_tanh=False,
                    out_dtype=jnp.float32):
    """x_blocks: (N, NB, Cin, (trs+2)*wps + 2) halo row-blocks of the zero-padded
    source image; w_fused: (16, Cout, Cin); b: (Cout, 1).
    Returns (out (N,NB,4,Cout,trs*wps), ch_sum (N,Cout,1), ch_sqsum (N,Cout,1))."""
    n, nb, cin, rblk = x_blocks.shape
    _, cout, _ = w_fused.shape
    trs = rblk // wps - 2
    assert rblk == (trs + 2) * wps + 2
    r = trs * wps
    kernel = functools.partial(_upconv_kernel, wps=wps, ws=ws, use_tanh=use_tanh)
    return pl.pallas_call(
        kernel,
        out_shape=(
            jax.ShapeDtypeStruct((n, nb, 4, cout, r), out_dtype),
            jax.ShapeDtypeStruct((n, cout, 1), jnp.float32),
            jax.ShapeDtypeStruct((n, cout, 1), jnp.float32),
        ),
        grid=(n, nb),
        in_specs=[
            pl.BlockSpec((None, None, cin, rblk), lambda i, j: (i, j, 0, 0)),
            pl.BlockSpec((16, cout, cin), lambda i, j: (0, 0, 0)),
            pl.BlockSpec((cout, 1), lambda i, j: (0, 0)),
        ],
        out_specs=(
            pl.BlockSpec((None, None, 4, cout, r), lambda i, j: (i, j, 0, 0, 0)),
            pl.BlockSpec((None, cout, 1), lambda i, j: (i, 0, 0)),
            pl.BlockSpec((None, cout, 1), lambda i, j: (i, 0, 0)),
        ),
        compiler_params=pltpu.CompilerParams(
            dimension_semantics=("parallel", "arbitrary"),
            vmem_limit_bytes=VMEM_LIMIT,
        ),
    )(x_blocks, w_fused, b)


# ---------------------------------------------------------------------------
# Lane-dense per-row (= per (sample, channel)) statistics and affine kernels.
# ---------------------------------------------------------------------------
def _row_stats_kernel(x_ref, s_ref, q_ref):
    x = x_ref[...]
    s_ref[...] = jnp.sum(x, axis=1, keepdims=True)
    q_ref[...] = jnp.sum(x * x, axis=1, keepdims=True)


def row_stats(x, *, tm):
    m, c = x.shape
    assert m % tm == 0
    return pl.pallas_call(
        _row_stats_kernel,
        out_shape=(jax.ShapeDtypeStruct((m, 1), jnp.float32),
                   jax.ShapeDtypeStruct((m, 1), jnp.float32)),
        grid=(m // tm,),
        in_specs=[pl.BlockSpec((tm, c), lambda i: (i, 0))],
        out_specs=(pl.BlockSpec((tm, 1), lambda i: (i, 0)),
                   pl.BlockSpec((tm, 1), lambda i: (i, 0))),
        compiler_params=pltpu.CompilerParams(
            dimension_semantics=("parallel",)),
    )(x)


def _row_affine_kernel(x_ref, a_ref, b_ref, o_ref, *, leaky):
    y = x_ref[...] * a_ref[...] + b_ref[...]
    if leaky:
        y = jnp.where(y > 0, y, 0.2 * y)
    o_ref[...] = y.astype(o_ref.dtype)


def row_affine(x, scale_rows, shift_rows, *, tm, leaky=False,
               out_dtype=jnp.float32):
    m, c = x.shape
    assert m % tm == 0
    kernel = functools.partial(_row_affine_kernel, leaky=leaky)
    return pl.pallas_call(
        kernel,
        out_shape=jax.ShapeDtypeStruct((m, c), out_dtype),
        grid=(m // tm,),
        in_specs=[
            pl.BlockSpec((tm, c), lambda i: (i, 0)),
            pl.BlockSpec((tm, 1), lambda i: (i, 0)),
            pl.BlockSpec((tm, 1), lambda i: (i, 0)),
        ],
        out_specs=pl.BlockSpec((tm, c), lambda i: (i, 0)),
        compiler_params=pltpu.CompilerParams(
            dimension_semantics=("parallel",)),
    )(x, scale_rows, shift_rows)


# ---------------------------------------------------------------------------
# XLA glue: BN scale/shift folding, source-resolution pad + halo packing,
# parity-class output unpack/interleave.
# ---------------------------------------------------------------------------
def _bn_scale_shift(ch_sum, ch_sqsum, count, gamma, beta):
    mean = ch_sum / count
    var = ch_sqsum / count - mean * mean          # biased var (PyTorch training)
    inv = 1.0 / jnp.sqrt(var + EPS)
    scale = inv if gamma is None else gamma * inv
    shift = -mean * scale if beta is None else beta - mean * scale
    return scale.astype(jnp.float32), shift.astype(jnp.float32)


def _pack_source(x_nchw, trs, wps):
    """Zero pad(1), pad width to wps lanes, flatten rows, cut into overlapping
    halo row-blocks: (N,C,Hs,Ws) -> (N, NB, C, (trs+2)*wps + 2), NB = Hs//trs."""
    n, c, hs, ws = x_nchw.shape
    nb = hs // trs
    rblk = (trs + 2) * wps + 2
    xp = jnp.pad(x_nchw, ((0, 0), (0, 0), (1, 1), (1, wps - ws - 1)))
    flat = jnp.pad(xp.reshape(n, c, (hs + 2) * wps), ((0, 0), (0, 0), (0, 2)))
    blocks = [flat[:, :, j * trs * wps: j * trs * wps + rblk] for j in range(nb)]
    return jnp.stack(blocks, axis=1)


def _unpack_upconv(y, wps, ws):
    """(N, NB, 4, C, trs*wps) -> (N, C, 2*NB*trs, 2*ws): drop width-pad junk and
    interleave the 4 output-parity classes."""
    n, nb, _, c, r = y.shape
    trs = r // wps
    y = y.reshape(n, nb, 2, 2, c, trs, wps)[..., :ws]
    y = y.transpose(0, 4, 1, 5, 2, 6, 3)          # (n, c, nb, a, py, b, px)
    return y.reshape(n, c, 2 * nb * trs, 2 * ws)


# ---------------------------------------------------------------------------
# Full Generator forward.
# ---------------------------------------------------------------------------
def generator_forward(x, p):
    n = x.shape[0]

    # Linear(256 -> 401408): columns already in (c, h, w) order (PyTorch layout).
    h = linear(x, p["w_lin_t"], p["b_lin"])                    # (N, 401408) f32
    h = h.reshape(n * 128, 56 * 56)                            # channel-major rows

    # BatchNorm2d(128), training-mode batch stats.
    rs, rq = row_stats(h, tm=128)
    sc1, sh1 = _bn_scale_shift(rs.reshape(n, 128).sum(0),
                               rq.reshape(n, 128).sum(0),
                               n * 56 * 56, p["bn1_g"], p["bn1_b"])
    h = row_affine(h, jnp.tile(sc1, n)[:, None], jnp.tile(sh1, n)[:, None],
                   tm=128, out_dtype=jnp.bfloat16)             # (N*128, 3136) bf16

    # Upsample(2) + Conv2d(128->64): fused parity-class conv on the 56x56 source,
    # with bias + BN2 batch stats fused.
    wps1, ws1, trs1 = 64, 56, 56                               # 1 row-block/sample
    xb = _pack_source(h.reshape(n, 128, 56, 56), trs1, wps1)   # (N,1,128,3714)
    c1, s2n, q2n = upconv3x3_fused(xb, p["w_c1"], p["b_c1"],
                                   wps=wps1, ws=ws1, out_dtype=jnp.bfloat16)
    nb1, r1 = c1.shape[1], c1.shape[-1]
    sc2, sh2 = _bn_scale_shift(s2n.sum(0)[:, 0], q2n.sum(0)[:, 0],
                               n * 112 * 112, p["bn2_g"], p["bn2_b"])

    # BN2 apply + LeakyReLU(0.2), lane dense, then assemble the 112x112 image.
    h = row_affine(c1.reshape(n * nb1 * 4 * 64, r1),
                   jnp.tile(sc2, n * nb1 * 4)[:, None],
                   jnp.tile(sh2, n * nb1 * 4)[:, None],
                   tm=128, leaky=True, out_dtype=jnp.bfloat16)
    h = _unpack_upconv(h.reshape(n, nb1, 4, 64, r1), wps1, ws1)  # (N,64,112,112)

    # Upsample(2) + Conv2d(64->3) + Tanh: fused conv on the 112x112 source,
    # with bias + BN3 batch stats fused.
    wps2, ws2, trs2 = 128, 112, 28                             # 4 row-blocks/sample
    xb = _pack_source(h, trs2, wps2)                           # (N,4,64,3842)
    c2, s3n, q3n = upconv3x3_fused(xb, p["w_c2"], p["b_c2"],
                                   wps=wps2, ws=ws2, use_tanh=True,
                                   out_dtype=jnp.float32)
    nb2, r2 = c2.shape[1], c2.shape[-1]
    sc3, sh3 = _bn_scale_shift(s3n.sum(0)[:, 0], q3n.sum(0)[:, 0],
                               n * 224 * 224, None, None)      # affine=False

    # BN3 apply and final NCHW assembly.
    rows2 = n * nb2 * 4 * 3
    out = row_affine(c2.reshape(rows2, r2),
                     jnp.tile(sc3, n * nb2 * 4)[:, None],
                     jnp.tile(sh3, n * nb2 * 4)[:, None],
                     tm=rows2, out_dtype=jnp.float32)
    out = _unpack_upconv(out.reshape(n, nb2, 4, 3, r2), wps2, ws2)
    return out                                                 # (N, 3, 224, 224)


def prepare_params(p):
    """One-time conversion of PyTorch-layout parameters to kernel layout.
    Conv weights are stored pre-combined for the fused upsample+conv kernel."""
    return {
        "w_lin_t": p["w_lin"].T.astype(jnp.bfloat16),              # (256, 401408)
        "b_lin": p["b_lin"].reshape(1, -1).astype(jnp.float32),
        "bn1_g": p["bn1_g"].astype(jnp.float32),
        "bn1_b": p["bn1_b"].astype(jnp.float32),
        "w_c1": fuse_upsample_conv_weights(p["w_c1"]).astype(jnp.bfloat16),
        "b_c1": p["b_c1"].reshape(-1, 1).astype(jnp.float32),
        "bn2_g": p["bn2_g"].astype(jnp.float32),
        "bn2_b": p["bn2_b"].astype(jnp.float32),
        "w_c2": fuse_upsample_conv_weights(p["w_c2"]).astype(jnp.bfloat16),
        "b_c2": p["b_c2"].reshape(-1, 1).astype(jnp.float32),
    }


if __name__ == "__main__":
    key = jax.random.PRNGKey(0)
    k = jax.random.split(key, 8)

    # ---- small numeric self-test of the fused upsample+conv kernel (f32) ----
    tks = jax.random.split(k[7], 3)
    ts, tci, tco = 8, 8, 8
    xt = jax.random.normal(tks[0], (1, tci, ts, ts), jnp.float32)
    wt = jax.random.normal(tks[1], (tco, tci, 3, 3), jnp.float32) * 0.2
    bt = jax.random.normal(tks[2], (tco,), jnp.float32) * 0.1
    yk, _, _ = upconv3x3_fused(_pack_source(xt, ts, 16),
                               fuse_upsample_conv_weights(wt),
                               bt.reshape(-1, 1), wps=16, ws=ts)
    yk = _unpack_upconv(yk, 16, ts)
    xu = jnp.repeat(jnp.repeat(xt, 2, axis=2), 2, axis=3)
    yr = lax.conv_general_dilated(xu, wt, (1, 1), ((1, 1), (1, 1)),
                                  dimension_numbers=("NCHW", "OIHW", "NCHW"),
                                  precision=lax.Precision.HIGHEST)
    yr = yr + bt.reshape(1, -1, 1, 1)
    max_err = float(jnp.max(jnp.abs(yk - yr)))
    assert max_err < 5e-2, max_err

    # ---- full Generator forward (module shapes; small batch) ----
    torch_params = {
        "w_lin": jax.random.normal(k[1], (401408, 256), jnp.float32) * 0.0625,
        "b_lin": jax.random.normal(k[2], (401408,), jnp.float32) * 0.01,
        "bn1_g": jnp.ones((128,), jnp.float32),
        "bn1_b": jnp.zeros((128,), jnp.float32),
        "w_c1": jax.random.normal(k[3], (64, 128, 3, 3), jnp.float32) * 0.03,
        "b_c1": jax.random.normal(k[4], (64,), jnp.float32) * 0.01,
        "bn2_g": jnp.ones((64,), jnp.float32),
        "bn2_b": jnp.zeros((64,), jnp.float32),
        "w_c2": jax.random.normal(k[5], (3, 64, 3, 3), jnp.float32) * 0.04,
        "b_c2": jax.random.normal(k[6], (3,), jnp.float32) * 0.01,
    }
    params = prepare_params(torch_params)

    x = jax.random.normal(k[0], (2, 256), jnp.float32)   # batch=2, in_features=256

    fwd = jax.jit(generator_forward)
    out = jax.block_until_ready(fwd(x, params))

    assert out.shape == (2, 3, 224, 224), out.shape
    assert out.dtype == jnp.float32
    assert bool(jnp.all(jnp.isfinite(out)))
    # Final layer is BatchNorm2d(3, affine=False) in training mode, so the
    # per-channel batch mean/std of the result must be ~0/~1 (end-to-end check).
    ch_mean = out.mean(axis=(0, 2, 3))
    ch_std = out.std(axis=(0, 2, 3))
    assert bool(jnp.all(jnp.abs(ch_mean) < 0.05)), ch_mean
    assert bool(jnp.all(jnp.abs(ch_std - 1.0) < 0.05)), ch_std
    print("KERNEL_OK")
</pallas_src>

<mosaic_0001>
module attributes {stable_mosaic.version = 11 : i64} {
  func.func @_upconv_kernel(%arg0: i32, %arg1: i32, %arg2: memref<1x1x8x162xf32, #tpu.memory_space<vmem>>, %arg3: memref<16x8x8xf32, #tpu.memory_space<vmem>>, %arg4: memref<8x1xf32, #tpu.memory_space<vmem>>, %arg5: memref<1x1x4x8x128xf32, #tpu.memory_space<vmem>>, %arg6: memref<1x8x1xf32, #tpu.memory_space<vmem>>, %arg7: memref<1x8x1xf32, #tpu.memory_space<vmem>>) attributes {dimension_semantics = [#tpu.dimension_semantics<parallel>, #tpu.dimension_semantics<arbitrary>], iteration_bounds = array<i64: 1, 1>, scalar_prefetch = 0 : i64, scratch_operands = 0 : i64, tpu.core_type = #tpu.core_type<tc>, window_params = [{transform_indices = @transform_0, window_bounds = array<i64: 1, 1, 8, 162>}, {pipeline_mode = #tpu.pipeline_mode<synchronous>, transform_indices = @transform_1, window_bounds = array<i64: 16, 8, 8>}, {pipeline_mode = #tpu.pipeline_mode<synchronous>, transform_indices = @transform_2, window_bounds = array<i64: 8, 1>}, {transform_indices = @transform_3, window_bounds = array<i64: 1, 1, 4, 8, 128>}, {transform_indices = @transform_4, window_bounds = array<i64: 1, 8, 1>}, {transform_indices = @transform_5, window_bounds = array<i64: 1, 8, 1>}]} {
    %c0_i32 = arith.constant 0 : i32
    %0 = arith.cmpi eq, %arg1, %c0_i32 : i32
    %1 = arith.extui %0 : i1 to i32
    %c0_i32_0 = arith.constant 0 : i32
    %2 = arith.cmpi ne, %1, %c0_i32_0 : i32
    scf.if %2 {
      %cst_191 = arith.constant 0.000000e+00 : f32
      %282 = vector.broadcast %cst_191 : f32 to vector<8x1xf32>
      %c0_192 = arith.constant 0 : index
      %c0_193 = arith.constant 0 : index
      %c0_194 = arith.constant 0 : index
      %283 = vector.load %arg6[%c0_192, %c0_193, %c0_194] : memref<1x8x1xf32, #tpu.memory_space<vmem>>, vector<1x8x1xf32>
      %284 = vector.shape_cast %283 : vector<1x8x1xf32> to vector<8x1xf32>
      %285 = vector.shape_cast %282 : vector<8x1xf32> to vector<1x8x1xf32>
      tpu.vector_store %arg6[%c0_192, %c0_193, %c0_194], %285 {strides = array<i32>} : memref<1x8x1xf32, #tpu.memory_space<vmem>>, vector<1x8x1xf32>,
      %cst_195 = arith.constant 0.000000e+00 : f32
      %286 = vector.broadcast %cst_195 : f32 to vector<8x1xf32>
      %c0_196 = arith.constant 0 : index
      %c0_197 = arith.constant 0 : index
      %c0_198 = arith.constant 0 : index
      %287 = vector.load %arg7[%c0_196, %c0_197, %c0_198] : memref<1x8x1xf32, #tpu.memory_space<vmem>>, vector<1x8x1xf32>
      %288 = vector.shape_cast %287 : vector<1x8x1xf32> to vector<8x1xf32>
      %289 = vector.shape_cast %286 : vector<8x1xf32> to vector<1x8x1xf32>
      tpu.vector_store %arg7[%c0_196, %c0_197, %c0_198], %289 {strides = array<i32>} : memref<1x8x1xf32, #tpu.memory_space<vmem>>, vector<1x8x1xf32>,
    } else {
    }
    %c0 = arith.constant 0 : index
    %c0_1 = arith.constant 0 : index
    %3 = vector.load %arg4[%c0, %c0_1] : memref<8x1xf32, #tpu.memory_space<vmem>>, vector<8x1xf32>
    %cst = arith.constant 0.000000e+00 : f32
    %4 = vector.broadcast %cst : f32 to vector<8x1xf32>
    %cst_2 = arith.constant 0.000000e+00 : f32
    %5 = vector.broadcast %cst_2 : f32 to vector<8x1xf32>
    %cst_3 = arith.constant 0.000000e+00 : f32
    %6 = vector.broadcast %cst_3 : f32 to vector<8x128xf32>
    %c0_4 = arith.constant 0 : index
    %c0_5 = arith.constant 0 : index
    %c0_6 = arith.constant 0 : index
    %7 = vector.load %arg3[%c0_4, %c0_5, %c0_6] : memref<16x8x8xf32, #tpu.memory_space<vmem>>, vector<1x8x8xf32>
    %8 = vector.shape_cast %7 : vector<1x8x8xf32> to vector<8x8xf32>
    %c0_7 = arith.constant 0 : index
    %c0_8 = arith.constant 0 : index
    %c0_9 = arith.constant 0 : index
    %c0_10 = arith.constant 0 : index
    %9 = vector.load %arg2[%c0_7, %c0_8, %c0_9, %c0_10] : memref<1x1x8x162xf32, #tpu.memory_space<vmem>>, vector<1x1x8x128xf32>
    %10 = vector.shape_cast %9 : vector<1x1x8x128xf32> to vector<8x128xf32>
    %cst_11 = arith.constant dense<0.000000e+00> : vector<8x128xf32>
    %11 = tpu.matmul %8, %10, %cst_11 {dimension_numbers = #tpu.dot_dimension_numbers<[1], [0], [0], [1], [0, 0, 1, 1], [], []>} : vector<8x8xf32>, vector<8x128xf32>, vector<8x128xf32> -> vector<8x128xf32>
    %12 = arith.addf %6, %11 : vector<8x128xf32>
    %c1 = arith.constant 1 : index
    %c0_12 = arith.constant 0 : index
    %c0_13 = arith.constant 0 : index
    %13 = vector.load %arg3[%c1, %c0_12, %c0_13] : memref<16x8x8xf32, #tpu.memory_space<vmem>>, vector<1x8x8xf32>
    %14 = vector.shape_cast %13 : vector<1x8x8xf32> to vector<8x8xf32>
    %c0_14 = arith.constant 0 : index
    %c0_15 = arith.constant 0 : index
    %c0_16 = arith.constant 0 : index
    %c1_17 = arith.constant 1 : index
    %15 = vector.load %arg2[%c0_14, %c0_15, %c0_16, %c1_17] : memref<1x1x8x162xf32, #tpu.memory_space<vmem>>, vector<1x1x8x128xf32>
    %16 = vector.shape_cast %15 : vector<1x1x8x128xf32> to vector<8x128xf32>
    %cst_18 = arith.constant dense<0.000000e+00> : vector<8x128xf32>
    %17 = tpu.matmul %14, %16, %cst_18 {dimension_numbers = #tpu.dot_dimension_numbers<[1], [0], [0], [1], [0, 0, 1, 1], [], []>} : vector<8x8xf32>, vector<8x128xf32>, vector<8x128xf32> -> vector<8x128xf32>
    %18 = arith.addf %12, %17 : vector<8x128xf32>
    %c2 = arith.constant 2 : index
    %c0_19 = arith.constant 0 : index
    %c0_20 = arith.constant 0 : index
    %19 = vector.load %arg3[%c2, %c0_19, %c0_20] : memref<16x8x8xf32, #tpu.memory_space<vmem>>, vector<1x8x8xf32>
    %20 = vector.shape_cast %19 : vector<1x8x8xf32> to vector<8x8xf32>
    %c0_21 = arith.constant 0 : index
    %c0_22 = arith.constant 0 : index
    %c0_23 = arith.constant 0 : index
    %c16 = arith.constant 16 : index
    %21 = vector.load %arg2[%c0_21, %c0_22, %c0_23, %c16] : memref<1x1x8x162xf32, #tpu.memory_space<vmem>>, vector<1x1x8x128xf32>
    %22 = vector.shape_cast %21 : vector<1x1x8x128xf32> to vector<8x128xf32>
    %cst_24 = arith.constant dense<0.000000e+00> : vector<8x128xf32>
    %23 = tpu.matmul %20, %22, %cst_24 {dimension_numbers = #tpu.dot_dimension_numbers<[1], [0], [0], [1], [0, 0, 1, 1], [], []>} : vector<8x8xf32>, vector<8x128xf32>, vector<8x128xf32> -> vector<8x128xf32>
    %24 = arith.addf %18, %23 : vector<8x128xf32>
    %c3 = arith.constant 3 : index
    %c0_25 = arith.constant 0 : index
    %c0_26 = arith.constant 0 : index
    %25 = vector.load %arg3[%c3, %c0_25, %c0_26] : memref<16x8x8xf32, #tpu.memory_space<vmem>>, vector<1x8x8xf32>
    %26 = vector.shape_cast %25 : vector<1x8x8xf32> to vector<8x8xf32>
    %c0_27 = arith.constant 0 : index
    %c0_28 = arith.constant 0 : index
    %c0_29 = arith.constant 0 : index
    %c17 = arith.constant 17 : index
    %27 = vector.load %arg2[%c0_27, %c0_28, %c0_29, %c17] : memref<1x1x8x162xf32, #tpu.memory_space<vmem>>, vector<1x1x8x128xf32>
    %28 = vector.shape_cast %27 : vector<1x1x8x128xf32> to vector<8x128xf32>
    %cst_30 = arith.constant dense<0.000000e+00> : vector<8x128xf32>
    %29 = tpu.matmul %26, %28, %cst_30 {dimension_numbers = #tpu.dot_dimension_numbers<[1], [0], [0], [1], [0, 0, 1, 1], [], []>} : vector<8x8xf32>, vector<8x128xf32>, vector<8x128xf32> -> vector<8x128xf32>
    %30 = arith.addf %24, %29 : vector<8x128xf32>
    %31 = vector.broadcast %3 : vector<8x1xf32> to vector<8x128xf32>
    %32 = arith.addf %30, %31 : vector<8x128xf32>
    %c0_31 = arith.constant 0 : index
    %c0_32 = arith.constant 0 : index
    %c0_33 = arith.constant 0 : index
    %c0_34 = arith.constant 0 : index
    %c0_35 = arith.constant 0 : index
    %33 = vector.load %arg5[%c0_31, %c0_32, %c0_33, %c0_34, %c0_35] : memref<1x1x4x8x128xf32, #tpu.memory_space<vmem>>, vector<1x1x1x8x128xf32>
    %34 = vector.shape_cast %33 : vector<1x1x1x8x128xf32> to vector<8x128xf32>
    %35 = vector.shape_cast %32 : vector<8x128xf32> to vector<1x1x1x8x128xf32>
    tpu.vector_store %arg5[%c0_31, %c0_32, %c0_33, %c0_34, %c0_35], %35 {strides = array<i32>} : memref<1x1x4x8x128xf32, #tpu.memory_space<vmem>>, vector<1x1x1x8x128xf32>,
    %36 = tpu.iota {dimensions = array<i32: 1>} : vector<1x128xi32>
    %c0_i32_36 = arith.constant 0 : i32
    %37 = vector.broadcast %c0_i32_36 : i32 to vector<1x128xi32>
    %38 = arith.addi %36, %37 : vector<1x128xi32>
    %c16_i32 = arith.constant 16 : i32
    %c0_i32_37 = arith.constant 0 : i32
    %39 = arith.cmpi eq, %c16_i32, %c0_i32_37 : i32
    %c1_i32 = arith.constant 1 : i32
    %40 = arith.select %39, %c1_i32, %c16_i32 : i32
    %41 = vector.broadcast %40 : i32 to vector<1x128xi32>
    %42 = arith.remsi %38, %41 : vector<1x128xi32>
    %c0_i32_38 = arith.constant 0 : i32
    %43 = vector.broadcast %c0_i32_38 : i32 to vector<1x128xi32>
    %44 = arith.cmpi ne, %42, %43 : vector<1x128xi32>
    %c0_i32_39 = arith.constant 0 : i32
    %45 = vector.broadcast %c0_i32_39 : i32 to vector<1x128xi32>
    %46 = arith.cmpi slt, %42, %45 : vector<1x128xi32>
    %c0_i32_40 = arith.constant 0 : i32
    %47 = arith.cmpi slt, %40, %c0_i32_40 : i32
    %48 = vector.broadcast %47 : i1 to vector<1x128xi1>
    %49 = vector.broadcast %48 : vector<1x128xi1> to vector<1x128xi1>
    %50 = arith.xori %46, %49 : vector<1x128xi1>
    %51 = arith.andi %50, %44 : vector<1x128xi1>
    %52 = vector.broadcast %40 : i32 to vector<1x128xi32>
    %53 = arith.addi %42, %52 : vector<1x128xi32>
    %54 = arith.select %51, %53, %42 : vector<1x128xi1>, vector<1x128xi32>
    %c8_i32 = arith.constant 8 : i32
    %55 = vector.broadcast %c8_i32 : i32 to vector<1x128xi32>
    %56 = arith.cmpi slt, %54, %55 : vector<1x128xi32>
    %cst_41 = arith.constant 0.000000e+00 : f32
    %57 = vector.shape_cast %56 : vector<1x128xi1> to vector<1x128xi1>
    %58 = vector.broadcast %57 : vector<1x128xi1> to vector<8x128xi1>
    %59 = vector.broadcast %cst_41 : f32 to vector<8x128xf32>
    %60 = arith.select %58, %32, %59 : vector<8x128xi1>, vector<8x128xf32>
    %cst_42 = arith.constant dense<0.000000e+00> : vector<8xf32>
    %61 = vector.multi_reduction <add>, %60, %cst_42 [1] : vector<8x128xf32> to vector<8xf32>
    %62 = vector.shape_cast %61 : vector<8xf32> to vector<8x1xf32>
    %63 = arith.addf %4, %62 : vector<8x1xf32>
    %64 = arith.mulf %32, %32 : vector<8x128xf32>
    %cst_43 = arith.constant 0.000000e+00 : f32
    %65 = vector.shape_cast %56 : vector<1x128xi1> to vector<1x128xi1>
    %66 = vector.broadcast %65 : vector<1x128xi1> to vector<8x128xi1>
    %67 = vector.broadcast %cst_43 : f32 to vector<8x128xf32>
    %68 = arith.select %66, %64, %67 : vector<8x128xi1>, vector<8x128xf32>
    %cst_44 = arith.constant dense<0.000000e+00> : vector<8xf32>
    %69 = vector.multi_reduction <add>, %68, %cst_44 [1] : vector<8x128xf32> to vector<8xf32>
    %70 = vector.shape_cast %69 : vector<8xf32> to vector<8x1xf32>
    %71 = arith.addf %5, %70 : vector<8x1xf32>
    %cst_45 = arith.constant 0.000000e+00 : f32
    %72 = vector.broadcast %cst_45 : f32 to vector<8x128xf32>
    %c4 = arith.constant 4 : index
    %c0_46 = arith.constant 0 : index
    %c0_47 = arith.constant 0 : index
    %73 = vector.load %arg3[%c4, %c0_46, %c0_47] : memref<16x8x8xf32, #tpu.memory_space<vmem>>, vector<1x8x8xf32>
    %74 = vector.shape_cast %73 : vector<1x8x8xf32> to vector<8x8xf32>
    %c0_48 = arith.constant 0 : index
    %c0_49 = arith.constant 0 : index
    %c0_50 = arith.constant 0 : index
    %c1_51 = arith.constant 1 : index
    %75 = vector.load %arg2[%c0_48, %c0_49, %c0_50, %c1_51] : memref<1x1x8x162xf32, #tpu.memory_space<vmem>>, vector<1x1x8x128xf32>
    %76 = vector.shape_cast %75 : vector<1x1x8x128xf32> to vector<8x128xf32>
    %cst_52 = arith.constant dense<0.000000e+00> : vector<8x128xf32>
    %77 = tpu.matmul %74, %76, %cst_52 {dimension_numbers = #tpu.dot_dimension_numbers<[1], [0], [0], [1], [0, 0, 1, 1], [], []>} : vector<8x8xf32>, vector<8x128xf32>, vector<8x128xf32> -> vector<8x128xf32>
    %78 = arith.addf %72, %77 : vector<8x128xf32>
    %c5 = arith.constant 5 : index
    %c0_53 = arith.constant 0 : index
    %c0_54 = arith.constant 0 : index
    %79 = vector.load %arg3[%c5, %c0_53, %c0_54] : memref<16x8x8xf32, #tpu.memory_space<vmem>>, vector<1x8x8xf32>
    %80 = vector.shape_cast %79 : vector<1x8x8xf32> to vector<8x8xf32>
    %c0_55 = arith.constant 0 : index
    %c0_56 = arith.constant 0 : index
    %c0_57 = arith.constant 0 : index
    %c2_58 = arith.constant 2 : index
    %81 = vector.load %arg2[%c0_55, %c0_56, %c0_57, %c2_58] : memref<1x1x8x162xf32, #tpu.memory_space<vmem>>, vector<1x1x8x128xf32>
    %82 = vector.shape_cast %81 : vector<1x1x8x128xf32> to vector<8x128xf32>
    %cst_59 = arith.constant dense<0.000000e+00> : vector<8x128xf32>
    %83 = tpu.matmul %80, %82, %cst_59 {dimension_numbers = #tpu.dot_dimension_numbers<[1], [0], [0], [1], [0, 0, 1, 1], [], []>} : vector<8x8xf32>, vector<8x128xf32>, vector<8x128xf32> -> vector<8x128xf32>
    %84 = arith.addf %78, %83 : vector<8x128xf32>
    %c6 = arith.constant 6 : index
    %c0_60 = arith.constant 0 : index
    %c0_61 = arith.constant 0 : index
    %85 = vector.load %arg3[%c6, %c0_60, %c0_61] : memref<16x8x8xf32, #tpu.memory_space<vmem>>, vector<1x8x8xf32>
    %86 = vector.shape_cast %85 : vector<1x8x8xf32> to vector<8x8xf32>
    %c0_62 = arith.constant 0 : index
    %c0_63 = arith.constant 0 : index
    %c0_64 = arith.constant 0 : index
    %c17_65 = arith.constant 17 : index
    %87 = vector.load %arg2[%c0_62, %c0_63, %c0_64, %c17_65] : memref<1x1x8x162xf32, #tpu.memory_space<vmem>>, vector<1x1x8x128xf32>
    %88 = vector.shape_cast %87 : vector<1x1x8x128xf32> to vector<8x128xf32>
    %cst_66 = arith.constant dense<0.000000e+00> : vector<8x128xf32>
    %89 = tpu.matmul %86, %88, %cst_66 {dimension_numbers = #tpu.dot_dimension_numbers<[1], [0], [0], [1], [0, 0, 1, 1], [], []>} : vector<8x8xf32>, vector<8x128xf32>, vector<8x128xf32> -> vector<8x128xf32>
    %90 = arith.addf %84, %89 : vector<8x128xf32>
    %c7 = arith.constant 7 : index
    %c0_67 = arith.constant 0 : index
    %c0_68 = arith.constant 0 : index
    %91 = vector.load %arg3[%c7, %c0_67, %c0_68] : memref<16x8x8xf32, #tpu.memory_space<vmem>>, vector<1x8x8xf32>
    %92 = vector.shape_cast %91 : vector<1x8x8xf32> to vector<8x8xf32>
    %c0_69 = arith.constant 0 : index
    %c0_70 = arith.constant 0 : index
    %c0_71 = arith.constant 0 : index
    %c18 = arith.constant 18 : index
    %93 = vector.load %arg2[%c0_69, %c0_70, %c0_71, %c18] : memref<1x1x8x162xf32, #tpu.memory_space<vmem>>, vector<1x1x8x128xf32>
    %94 = vector.shape_cast %93 : vector<1x1x8x128xf32> to vector<8x128xf32>
    %cst_72 = arith.constant dense<0.000000e+00> : vector<8x128xf32>
    %95 = tpu.matmul %92, %94, %cst_72 {dimension_numbers = #tpu.dot_dimension_numbers<[1], [0], [0], [1], [0, 0, 1, 1], [], []>} : vector<8x8xf32>, vector<8x128xf32>, vector<8x128xf32> -> vector<8x128xf32>
    %96 = arith.addf %90, %95 : vector<8x128xf32>
    %97 = vector.broadcast %3 : vector<8x1xf32> to vector<8x128xf32>
    %98 = arith.addf %96, %97 : vector<8x128xf32>
    %c0_73 = arith.constant 0 : index
    %c0_74 = arith.constant 0 : index
    %c1_75 = arith.constant 1 : index
    %c0_76 = arith.constant 0 : index
    %c0_77 = arith.constant 0 : index
    %99 = vector.load %arg5[%c0_73, %c0_74, %c1_75, %c0_76, %c0_77] : memref<1x1x4x8x128xf32, #tpu.memory_space<vmem>>, vector<1x1x1x8x128xf32>
    %100 = vector.shape_cast %99 : vector<1x1x1x8x128xf32> to vector<8x128xf32>
    %101 = vector.shape_cast %98 : vector<8x128xf32> to vector<1x1x1x8x128xf32>
    tpu.vector_store %arg5[%c0_73, %c0_74, %c1_75, %c0_76, %c0_77], %101 {strides = array<i32>} : memref<1x1x4x8x128xf32, #tpu.memory_space<vmem>>, vector<1x1x1x8x128xf32>,
    %102 = tpu.iota {dimensions = array<i32: 1>} : vector<1x128xi32>
    %c0_i32_78 = arith.constant 0 : i32
    %103 = vector.broadcast %c0_i32_78 : i32 to vector<1x128xi32>
    %104 = arith.addi %102, %103 : vector<1x128xi32>
    %c16_i32_79 = arith.constant 16 : i32
    %c0_i32_80 = arith.constant 0 : i32
    %105 = arith.cmpi eq, %c16_i32_79, %c0_i32_80 : i32
    %c1_i32_81 = arith.constant 1 : i32
    %106 = arith.select %105, %c1_i32_81, %c16_i32_79 : i32
    %107 = vector.broadcast %106 : i32 to vector<1x128xi32>
    %108 = arith.remsi %104, %107 : vector<1x128xi32>
    %c0_i32_82 = arith.constant 0 : i32
    %109 = vector.broadcast %c0_i32_82 : i32 to vector<1x128xi32>
    %110 = arith.cmpi ne, %108, %109 : vector<1x128xi32>
    %c0_i32_83 = arith.constant 0 : i32
    %111 = vector.broadcast %c0_i32_83 : i32 to vector<1x128xi32>
    %112 = arith.cmpi slt, %108, %111 : vector<1x128xi32>
    %c0_i32_84 = arith.constant 0 : i32
    %113 = arith.cmpi slt, %106, %c0_i32_84 : i32
    %114 = vector.broadcast %113 : i1 to vector<1x128xi1>
    %115 = vector.broadcast %114 : vector<1x128xi1> to vector<1x128xi1>
    %116 = arith.xori %112, %115 : vector<1x128xi1>
    %117 = arith.andi %116, %110 : vector<1x128xi1>
    %118 = vector.broadcast %106 : i32 to vector<1x128xi32>
    %119 = arith.addi %108, %118 : vector<1x128xi32>
    %120 = arith.select %117, %119, %108 : vector<1x128xi1>, vector<1x128xi32>
    %c8_i32_85 = arith.constant 8 : i32
    %121 = vector.broadcast %c8_i32_85 : i32 to vector<1x128xi32>
    %122 = arith.cmpi slt, %120, %121 : vector<1x128xi32>
    %cst_86 = arith.constant 0.000000e+00 : f32
    %123 = vector.shape_cast %122 : vector<1x128xi1> to vector<1x128xi1>
    %124 = vector.broadcast %123 : vector<1x128xi1> to vector<8x128xi1>
    %125 = vector.broadcast %cst_86 : f32 to vector<8x128xf32>
    %126 = arith.select %124, %98, %125 : vector<8x128xi1>, vector<8x128xf32>
    %cst_87 = arith.constant dense<0.000000e+00> : vector<8xf32>
    %127 = vector.multi_reduction <add>, %126, %cst_87 [1] : vector<8x128xf32> to vector<8xf32>
    %128 = vector.shape_cast %127 : vector<8xf32> to vector<8x1xf32>
    %129 = arith.addf %63, %128 : vector<8x1xf32>
    %130 = arith.mulf %98, %98 : vector<8x128xf32>
    %cst_88 = arith.constant 0.000000e+00 : f32
    %131 = vector.shape_cast %122 : vector<1x128xi1> to vector<1x128xi1>
    %132 = vector.broadcast %131 : vector<1x128xi1> to vector<8x128xi1>
    %133 = vector.broadcast %cst_88 : f32 to vector<8x128xf32>
    %134 = arith.select %132, %130, %133 : vector<8x128xi1>, vector<8x128xf32>
    %cst_89 = arith.constant dense<0.000000e+00> : vector<8xf32>
    %135 = vector.multi_reduction <add>, %134, %cst_89 [1] : vector<8x128xf32> to vector<8xf32>
    %136 = vector.shape_cast %135 : vector<8xf32> to vector<8x1xf32>
    %137 = arith.addf %71, %136 : vector<8x1xf32>
    %cst_90 = arith.constant 0.000000e+00 : f32
    %138 = vector.broadcast %cst_90 : f32 to vector<8x128xf32>
    %c8 = arith.constant 8 : index
    %c0_91 = arith.constant 0 : index
    %c0_92 = arith.constant 0 : index
    %139 = vector.load %arg3[%c8, %c0_91, %c0_92] : memref<16x8x8xf32, #tpu.memory_space<vmem>>, vector<1x8x8xf32>
    %140 = vector.shape_cast %139 : vector<1x8x8xf32> to vector<8x8xf32>
    %c0_93 = arith.constant 0 : index
    %c0_94 = arith.constant 0 : index
    %c0_95 = arith.constant 0 : index
    %c16_96 = arith.constant 16 : index
    %141 = vector.load %arg2[%c0_93, %c0_94, %c0_95, %c16_96] : memref<1x1x8x162xf32, #tpu.memory_space<vmem>>, vector<1x1x8x128xf32>
    %142 = vector.shape_cast %141 : vector<1x1x8x128xf32> to vector<8x128xf32>
    %cst_97 = arith.constant dense<0.000000e+00> : vector<8x128xf32>
    %143 = tpu.matmul %140, %142, %cst_97 {dimension_numbers = #tpu.dot_dimension_numbers<[1], [0], [0], [1], [0, 0, 1, 1], [], []>} : vector<8x8xf32>, vector<8x128xf32>, vector<8x128xf32> -> vector<8x128xf32>
    %144 = arith.addf %138, %143 : vector<8x128xf32>
    %c9 = arith.constant 9 : index
    %c0_98 = arith.constant 0 : index
    %c0_99 = arith.constant 0 : index
    %145 = vector.load %arg3[%c9, %c0_98, %c0_99] : memref<16x8x8xf32, #tpu.memory_space<vmem>>, vector<1x8x8xf32>
    %146 = vector.shape_cast %145 : vector<1x8x8xf32> to vector<8x8xf32>
    %c0_100 = arith.constant 0 : index
    %c0_101 = arith.constant 0 : index
    %c0_102 = arith.constant 0 : index
    %c17_103 = arith.constant 17 : index
    %147 = vector.load %arg2[%c0_100, %c0_101, %c0_102, %c17_103] : memref<1x1x8x162xf32, #tpu.memory_space<vmem>>, vector<1x1x8x128xf32>
    %148 = vector.shape_cast %147 : vector<1x1x8x128xf32> to vector<8x128xf32>
    %cst_104 = arith.constant dense<0.000000e+00> : vector<8x128xf32>
    %149 = tpu.matmul %146, %148, %cst_104 {dimension_numbers = #tpu.dot_dimension_numbers<[1], [0], [0], [1], [0, 0, 1, 1], [], []>} : vector<8x8xf32>, vector<8x128xf32>, vector<8x128xf32> -> vector<8x128xf32>
    %150 = arith.addf %144, %149 : vector<8x128xf32>
    %c10 = arith.constant 10 : index
    %c0_105 = arith.constant 0 : index
    %c0_106 = arith.constant 0 : index
    %151 = vector.load %arg3[%c10, %c0_105, %c0_106] : memref<16x8x8xf32, #tpu.memory_space<vmem>>, vector<1x8x8xf32>
    %152 = vector.shape_cast %151 : vector<1x8x8xf32> to vector<8x8xf32>
    %c0_107 = arith.constant 0 : index
    %c0_108 = arith.constant 0 : index
    %c0_109 = arith.constant 0 : index
    %c32 = arith.constant 32 : index
    %153 = vector.load %arg2[%c0_107, %c0_108, %c0_109, %c32] : memref<1x1x8x162xf32, #tpu.memory_space<vmem>>, vector<1x1x8x128xf32>
    %154 = vector.shape_cast %153 : vector<1x1x8x128xf32> to vector<8x128xf32>
    %cst_110 = arith.constant dense<0.000000e+00> : vector<8x128xf32>
    %155 = tpu.matmul %152, %154, %cst_110 {dimension_numbers = #tpu.dot_dimension_numbers<[1], [0], [0], [1], [0, 0, 1, 1], [], []>} : vector<8x8xf32>, vector<8x128xf32>, vector<8x128xf32> -> vector<8x128xf32>
    %156 = arith.addf %150, %155 : vector<8x128xf32>
    %c11 = arith.constant 11 : index
    %c0_111 = arith.constant 0 : index
    %c0_112 = arith.constant 0 : index
    %157 = vector.load %arg3[%c11, %c0_111, %c0_112] : memref<16x8x8xf32, #tpu.memory_space<vmem>>, vector<1x8x8xf32>
    %158 = vector.shape_cast %157 : vector<1x8x8xf32> to vector<8x8xf32>
    %c0_113 = arith.constant 0 : index
    %c0_114 = arith.constant 0 : index
    %c0_115 = arith.constant 0 : index
    %c33 = arith.constant 33 : index
    %159 = vector.load %arg2[%c0_113, %c0_114, %c0_115, %c33] : memref<1x1x8x162xf32, #tpu.memory_space<vmem>>, vector<1x1x8x128xf32>
    %160 = vector.shape_cast %159 : vector<1x1x8x128xf32> to vector<8x128xf32>
    %cst_116 = arith.constant dense<0.000000e+00> : vector<8x128xf32>
    %161 = tpu.matmul %158, %160, %cst_116 {dimension_numbers = #tpu.dot_dimension_numbers<[1], [0], [0], [1], [0, 0, 1, 1], [], []>} : vector<8x8xf32>, vector<8x128xf32>, vector<8x128xf32> -> vector<8x128xf32>
    %162 = arith.addf %156, %161 : vector<8x128xf32>
    %163 = vector.broadcast %3 : vector<8x1xf32> to vector<8x128xf32>
    %164 = arith.addf %162, %163 : vector<8x128xf32>
    %c0_117 = arith.constant 0 : index
    %c0_118 = arith.constant 0 : index
    %c2_119 = arith.constant 2 : index
    %c0_120 = arith.constant 0 : index
    %c0_121 = arith.constant 0 : index
    %165 = vector.load %arg5[%c0_117, %c0_118, %c2_119, %c0_120, %c0_121] : memref<1x1x4x8x128xf32, #tpu.memory_space<vmem>>, vector<1x1x1x8x128xf32>
    %166 = vector.shape_cast %165 : vector<1x1x1x8x128xf32> to vector<8x128xf32>
    %167 = vector.shape_cast %164 : vector<8x128xf32> to vector<1x1x1x8x128xf32>
    tpu.vector_store %arg5[%c0_117, %c0_118, %c2_119, %c0_120, %c0_121], %167 {strides = array<i32>} : memref<1x1x4x8x128xf32, #tpu.memory_space<vmem>>, vector<1x1x1x8x128xf32>,
    %168 = tpu.iota {dimensions = array<i32: 1>} : vector<1x128xi32>
    %c0_i32_122 = arith.constant 0 : i32
    %169 = vector.broadcast %c0_i32_122 : i32 to vector<1x128xi32>
    %170 = arith.addi %168, %169 : vector<1x128xi32>
    %c16_i32_123 = arith.constant 16 : i32
    %c0_i32_124 = arith.constant 0 : i32
    %171 = arith.cmpi eq, %c16_i32_123, %c0_i32_124 : i32
    %c1_i32_125 = arith.constant 1 : i32
    %172 = arith.select %171, %c1_i32_125, %c16_i32_123 : i32
    %173 = vector.broadcast %172 : i32 to vector<1x128xi32>
    %174 = arith.remsi %170, %173 : vector<1x128xi32>
    %c0_i32_126 = arith.constant 0 : i32
    %175 = vector.broadcast %c0_i32_126 : i32 to vector<1x128xi32>
    %176 = arith.cmpi ne, %174, %175 : vector<1x128xi32>
    %c0_i32_127 = arith.constant 0 : i32
    %177 = vector.broadcast %c0_i32_127 : i32 to vector<1x128xi32>
    %178 = arith.cmpi slt, %174, %177 : vector<1x128xi32>
    %c0_i32_128 = arith.constant 0 : i32
    %179 = arith.cmpi slt, %172, %c0_i32_128 : i32
    %180 = vector.broadcast %179 : i1 to vector<1x128xi1>
    %181 = vector.broadcast %180 : vector<1x128xi1> to vector<1x128xi1>
    %182 = arith.xori %178, %181 : vector<1x128xi1>
    %183 = arith.andi %182, %176 : vector<1x128xi1>
    %184 = vector.broadcast %172 : i32 to vector<1x128xi32>
    %185 = arith.addi %174, %184 : vector<1x128xi32>
    %186 = arith.select %183, %185, %174 : vector<1x128xi1>, vector<1x128xi32>
    %c8_i32_129 = arith.constant 8 : i32
    %187 = vector.broadcast %c8_i32_129 : i32 to vector<1x128xi32>
    %188 = arith.cmpi slt, %186, %187 : vector<1x128xi32>
    %cst_130 = arith.constant 0.000000e+00 : f32
    %189 = vector.shape_cast %188 : vector<1x128xi1> to vector<1x128xi1>
    %190 = vector.broadcast %189 : vector<1x128xi1> to vector<8x128xi1>
    %191 = vector.broadcast %cst_130 : f32 to vector<8x128xf32>
    %192 = arith.select %190, %164, %191 : vector<8x128xi1>, vector<8x128xf32>
    %cst_131 = arith.constant dense<0.000000e+00> : vector<8xf32>
    %193 = vector.multi_reduction <add>, %192, %cst_131 [1] : vector<8x128xf32> to vector<8xf32>
    %194 = vector.shape_cast %193 : vector<8xf32> to vector<8x1xf32>
    %195 = arith.addf %129, %194 : vector<8x1xf32>
    %196 = arith.mulf %164, %164 : vector<8x128xf32>
    %cst_132 = arith.constant 0.000000e+00 : f32
    %197 = vector.shape_cast %188 : vector<1x128xi1> to vector<1x128xi1>
    %198 = vector.broadcast %197 : vector<1x128xi1> to vector<8x128xi1>
    %199 = vector.broadcast %cst_132 : f32 to vector<8x128xf32>
    %200 = arith.select %198, %196, %199 : vector<8x128xi1>, vector<8x128xf32>
    %cst_133 = arith.constant dense<0.000000e+00> : vector<8xf32>
    %201 = vector.multi_reduction <add>, %200, %cst_133 [1] : vector<8x128xf32> to vector<8xf32>
    %202 = vector.shape_cast %201 : vector<8xf32> to vector<8x1xf32>
    %203 = arith.addf %137, %202 : vector<8x1xf32>
    %cst_134 = arith.constant 0.000000e+00 : f32
    %204 = vector.broadcast %cst_134 : f32 to vector<8x128xf32>
    %c12 = arith.constant 12 : index
    %c0_135 = arith.constant 0 : index
    %c0_136 = arith.constant 0 : index
    %205 = vector.load %arg3[%c12, %c0_135, %c0_136] : memref<16x8x8xf32, #tpu.memory_space<vmem>>, vector<1x8x8xf32>
    %206 = vector.shape_cast %205 : vector<1x8x8xf32> to vector<8x8xf32>
    %c0_137 = arith.constant 0 : index
    %c0_138 = arith.constant 0 : index
    %c0_139 = arith.constant 0 : index
    %c17_140 = arith.constant 17 : index
    %207 = vector.load %arg2[%c0_137, %c0_138, %c0_139, %c17_140] : memref<1x1x8x162xf32, #tpu.memory_space<vmem>>, vector<1x1x8x128xf32>
    %208 = vector.shape_cast %207 : vector<1x1x8x128xf32> to vector<8x128xf32>
    %cst_141 = arith.constant dense<0.000000e+00> : vector<8x128xf32>
    %209 = tpu.matmul %206, %208, %cst_141 {dimension_numbers = #tpu.dot_dimension_numbers<[1], [0], [0], [1], [0, 0, 1, 1], [], []>} : vector<8x8xf32>, vector<8x128xf32>, vector<8x128xf32> -> vector<8x128xf32>
    %210 = arith.addf %204, %209 : vector<8x128xf32>
    %c13 = arith.constant 13 : index
    %c0_142 = arith.constant 0 : index
    %c0_143 = arith.constant 0 : index
    %211 = vector.load %arg3[%c13, %c0_142, %c0_143] : memref<16x8x8xf32, #tpu.memory_space<vmem>>, vector<1x8x8xf32>
    %212 = vector.shape_cast %211 : vector<1x8x8xf32> to vector<8x8xf32>
    %c0_144 = arith.constant 0 : index
    %c0_145 = arith.constant 0 : index
    %c0_146 = arith.constant 0 : index
    %c18_147 = arith.constant 18 : index
    %213 = vector.load %arg2[%c0_144, %c0_145, %c0_146, %c18_147] : memref<1x1x8x162xf32, #tpu.memory_space<vmem>>, vector<1x1x8x128xf32>
    %214 = vector.shape_cast %213 : vector<1x1x8x128xf32> to vector<8x128xf32>
    %cst_148 = arith.constant dense<0.000000e+00> : vector<8x128xf32>
    %215 = tpu.matmul %212, %214, %cst_148 {dimension_numbers = #tpu.dot_dimension_numbers<[1], [0], [0], [1], [0, 0, 1, 1], [], []>} : vector<8x8xf32>, vector<8x128xf32>, vector<8x128xf32> -> vector<8x128xf32>
    %216 = arith.addf %210, %215 : vector<8x128xf32>
    %c14 = arith.constant 14 : index
    %c0_149 = arith.constant 0 : index
    %c0_150 = arith.constant 0 : index
    %217 = vector.load %arg3[%c14, %c0_149, %c0_150] : memref<16x8x8xf32, #tpu.memory_space<vmem>>, vector<1x8x8xf32>
    %218 = vector.shape_cast %217 : vector<1x8x8xf32> to vector<8x8xf32>
    %c0_151 = arith.constant 0 : index
    %c0_152 = arith.constant 0 : index
    %c0_153 = arith.constant 0 : index
    %c33_154 = arith.constant 33 : index
    %219 = vector.load %arg2[%c0_151, %c0_152, %c0_153, %c33_154] : memref<1x1x8x162xf32, #tpu.memory_space<vmem>>, vector<1x1x8x128xf32>
    %220 = vector.shape_cast %219 : vector<1x1x8x128xf32> to vector<8x128xf32>
    %cst_155 = arith.constant dense<0.000000e+00> : vector<8x128xf32>
    %221 = tpu.matmul %218, %220, %cst_155 {dimension_numbers = #tpu.dot_dimension_numbers<[1], [0], [0], [1], [0, 0, 1, 1], [], []>} : vector<8x8xf32>, vector<8x128xf32>, vector<8x128xf32> -> vector<8x128xf32>
    %222 = arith.addf %216, %221 : vector<8x128xf32>
    %c15 = arith.constant 15 : index
    %c0_156 = arith.constant 0 : index
    %c0_157 = arith.constant 0 : index
    %223 = vector.load %arg3[%c15, %c0_156, %c0_157] : memref<16x8x8xf32, #tpu.memory_space<vmem>>, vector<1x8x8xf32>
    %224 = vector.shape_cast %223 : vector<1x8x8xf32> to vector<8x8xf32>
    %c0_158 = arith.constant 0 : index
    %c0_159 = arith.constant 0 : index
    %c0_160 = arith.constant 0 : index
    %c34 = arith.constant 34 : index
    %225 = vector.load %arg2[%c0_158, %c0_159, %c0_160, %c34] : memref<1x1x8x162xf32, #tpu.memory_space<vmem>>, vector<1x1x8x128xf32>
    %226 = vector.shape_cast %225 : vector<1x1x8x128xf32> to vector<8x128xf32>
    %cst_161 = arith.constant dense<0.000000e+00> : vector<8x128xf32>
    %227 = tpu.matmul %224, %226, %cst_161 {dimension_numbers = #tpu.dot_dimension_numbers<[1], [0], [0], [1], [0, 0, 1, 1], [], []>} : vector<8x8xf32>, vector<8x128xf32>, vector<8x128xf32> -> vector<8x128xf32>
    %228 = arith.addf %222, %227 : vector<8x128xf32>
    %229 = vector.broadcast %3 : vector<8x1xf32> to vector<8x128xf32>
    %230 = arith.addf %228, %229 : vector<8x128xf32>
    %c0_162 = arith.constant 0 : index
    %c0_163 = arith.constant 0 : index
    %c3_164 = arith.constant 3 : index
    %c0_165 = arith.constant 0 : index
    %c0_166 = arith.constant 0 : index
    %231 = vector.load %arg5[%c0_162, %c0_163, %c3_164, %c0_165, %c0_166] : memref<1x1x4x8x128xf32, #tpu.memory_space<vmem>>, vector<1x1x1x8x128xf32>
    %232 = vector.shape_cast %231 : vector<1x1x1x8x128xf32> to vector<8x128xf32>
    %233 = vector.shape_cast %230 : vector<8x128xf32> to vector<1x1x1x8x128xf32>
    tpu.vector_store %arg5[%c0_162, %c0_163, %c3_164, %c0_165, %c0_166], %233 {strides = array<i32>} : memref<1x1x4x8x128xf32, #tpu.memory_space<vmem>>, vector<1x1x1x8x128xf32>,
    %234 = tpu.iota {dimensions = array<i32: 1>} : vector<1x128xi32>
    %c0_i32_167 = arith.constant 0 : i32
    %235 = vector.broadcast %c0_i32_167 : i32 to vector<1x128xi32>
    %236 = arith.addi %234, %235 : vector<1x128xi32>
    %c16_i32_168 = arith.constant 16 : i32
    %c0_i32_169 = arith.constant 0 : i32
    %237 = arith.cmpi eq, %c16_i32_168, %c0_i32_169 : i32
    %c1_i32_170 = arith.constant 1 : i32
    %238 = arith.select %237, %c1_i32_170, %c16_i32_168 : i32
    %239 = vector.broadcast %238 : i32 to vector<1x128xi32>
    %240 = arith.remsi %236, %239 : vector<1x128xi32>
    %c0_i32_171 = arith.constant 0 : i32
    %241 = vector.broadcast %c0_i32_171 : i32 to vector<1x128xi32>
    %242 = arith.cmpi ne, %240, %241 : vector<1x128xi32>
    %c0_i32_172 = arith.constant 0 : i32
    %243 = vector.broadcast %c0_i32_172 : i32 to vector<1x128xi32>
    %244 = arith.cmpi slt, %240, %243 : vector<1x128xi32>
    %c0_i32_173 = arith.constant 0 : i32
    %245 = arith.cmpi slt, %238, %c0_i32_173 : i32
    %246 = vector.broadcast %245 : i1 to vector<1x128xi1>
    %247 = vector.broadcast %246 : vector<1x128xi1> to vector<1x128xi1>
    %248 = arith.xori %244, %247 : vector<1x128xi1>
    %249 = arith.andi %248, %242 : vector<1x128xi1>
    %250 = vector.broadcast %238 : i32 to vector<1x128xi32>
    %251 = arith.addi %240, %250 : vector<1x128xi32>
    %252 = arith.select %249, %251, %240 : vector<1x128xi1>, vector<1x128xi32>
    %c8_i32_174 = arith.constant 8 : i32
    %253 = vector.broadcast %c8_i32_174 : i32 to vector<1x128xi32>
    %254 = arith.cmpi slt, %252, %253 : vector<1x128xi32>
    %cst_175 = arith.constant 0.000000e+00 : f32
    %255 = vector.shape_cast %254 : vector<1x128xi1> to vector<1x128xi1>
    %256 = vector.broadcast %255 : vector<1x128xi1> to vector<8x128xi1>
    %257 = vector.broadcast %cst_175 : f32 to vector<8x128xf32>
    %258 = arith.select %256, %230, %257 : vector<8x128xi1>, vector<8x128xf32>
    %cst_176 = arith.constant dense<0.000000e+00> : vector<8xf32>
    %259 = vector.multi_reduction <add>, %258, %cst_176 [1] : vector<8x128xf32> to vector<8xf32>
    %260 = vector.shape_cast %259 : vector<8xf32> to vector<8x1xf32>
    %261 = arith.addf %195, %260 : vector<8x1xf32>
    %262 = arith.mulf %230, %230 : vector<8x128xf32>
    %cst_177 = arith.constant 0.000000e+00 : f32
    %263 = vector.shape_cast %254 : vector<1x128xi1> to vector<1x128xi1>
    %264 = vector.broadcast %263 : vector<1x128xi1> to vector<8x128xi1>
    %265 = vector.broadcast %cst_177 : f32 to vector<8x128xf32>
    %266 = arith.select %264, %262, %265 : vector<8x128xi1>, vector<8x128xf32>
    %cst_178 = arith.constant dense<0.000000e+00> : vector<8xf32>
    %267 = vector.multi_reduction <add>, %266, %cst_178 [1] : vector<8x128xf32> to vector<8xf32>
    %268 = vector.shape_cast %267 : vector<8xf32> to vector<8x1xf32>
    %269 = arith.addf %203, %268 : vector<8x1xf32>
    %c0_179 = arith.constant 0 : index
    %c0_180 = arith.constant 0 : index
    %c0_181 = arith.constant 0 : index
    %270 = vector.load %arg6[%c0_179, %c0_180, %c0_181] : memref<1x8x1xf32, #tpu.memory_space<vmem>>, vector<1x8x1xf32>
    %271 = vector.shape_cast %270 : vector<1x8x1xf32> to vector<8x1xf32>
    %272 = arith.addf %271, %261 : vector<8x1xf32>
    %c0_182 = arith.constant 0 : index
    %c0_183 = arith.constant 0 : index
    %c0_184 = arith.constant 0 : index
    %273 = vector.load %arg6[%c0_182, %c0_183, %c0_184] : memref<1x8x1xf32, #tpu.memory_space<vmem>>, vector<1x8x1xf32>
    %274 = vector.shape_cast %273 : vector<1x8x1xf32> to vector<8x1xf32>
    %275 = vector.shape_cast %272 : vector<8x1xf32> to vector<1x8x1xf32>
    tpu.vector_store %arg6[%c0_182, %c0_183, %c0_184], %275 {strides = array<i32>} : memref<1x8x1xf32, #tpu.memory_space<vmem>>, vector<1x8x1xf32>,
    %c0_185 = arith.constant 0 : index
    %c0_186 = arith.constant 0 : index
    %c0_187 = arith.constant 0 : index
    %276 = vector.load %arg7[%c0_185, %c0_186, %c0_187] : memref<1x8x1xf32, #tpu.memory_space<vmem>>, vector<1x8x1xf32>
    %277 = vector.shape_cast %276 : vector<1x8x1xf32> to vector<8x1xf32>
    %278 = arith.addf %277, %269 : vector<8x1xf32>
    %c0_188 = arith.constant 0 : index
    %c0_189 = arith.constant 0 : index
    %c0_190 = arith.constant 0 : index
    %279 = vector.load %arg7[%c0_188, %c0_189, %c0_190] : memref<1x8x1xf32, #tpu.memory_space<vmem>>, vector<1x8x1xf32>
    %280 = vector.shape_cast %279 : vector<1x8x1xf32> to vector<8x1xf32>
    %281 = vector.shape_cast %278 : vector<8x1xf32> to vector<1x8x1xf32>
    tpu.vector_store %arg7[%c0_188, %c0_189, %c0_190], %281 {strides = array<i32>} : memref<1x8x1xf32, #tpu.memory_space<vmem>>, vector<1x8x1xf32>,
    return
  }
  func.func @transform_0(%arg0: i32, %arg1: i32) -> (i32, i32, i32, i32) {
    %c0_i32 = arith.constant 0 : i32
    %c0_i32_0 = arith.constant 0 : i32
    %c0_i32_1 = arith.constant 0 : i32
    return %arg0, %arg1, %c0_i32, %c0_i32_0 : i32, i32, i32, i32
  }
  func.func @transform_1(%arg0: i32, %arg1: i32) -> (i32, i32, i32) {
    %c0_i32 = arith.constant 0 : i32
    %c0_i32_0 = arith.constant 0 : i32
    %c0_i32_1 = arith.constant 0 : i32
    %c0_i32_2 = arith.constant 0 : i32
    return %c0_i32, %c0_i32_0, %c0_i32_1 : i32, i32, i32
  }
  func.func @transform_2(%arg0: i32, %arg1: i32) -> (i32, i32) {
    %c0_i32 = arith.constant 0 : i32
    %c0_i32_0 = arith.constant 0 : i32
    %c0_i32_1 = arith.constant 0 : i32
    return %c0_i32, %c0_i32_0 : i32, i32
  }
  func.func @transform_3(%arg0: i32, %arg1: i32) -> (i32, i32, i32, i32, i32) {
    %c0_i32 = arith.constant 0 : i32
    %c0_i32_0 = arith.constant 0 : i32
    %c0_i32_1 = arith.constant 0 : i32
    %c0_i32_2 = arith.constant 0 : i32
    return %arg0, %arg1, %c0_i32, %c0_i32_0, %c0_i32_1 : i32, i32, i32, i32, i32
  }
  func.func @transform_4(%arg0: i32, %arg1: i32) -> (i32, i32, i32) {
    %c0_i32 = arith.constant 0 : i32
    %c0_i32_0 = arith.constant 0 : i32
    %c0_i32_1 = arith.constant 0 : i32
    return %arg0, %c0_i32, %c0_i32_0 : i32, i32, i32
  }
  func.func @transform_5(%arg0: i32, %arg1: i32) -> (i32, i32, i32) {
    %c0_i32 = arith.constant 0 : i32
    %c0_i32_0 = arith.constant 0 : i32
    %c0_i32_1 = arith.constant 0 : i32
    return %arg0, %c0_i32, %c0_i32_0 : i32, i32, i32
  }
}

</mosaic_0001>

<bundles_post_ra>
// kernel: tpu_custom_call.1
= control target key start
LH: loop header
LB: loop body
LE: loop exit
PB: predicated region body
PF: predicated region fallthrough
CT: control target
= control target key end

     0   :  { %s1630_s20 = smov 112   ;;  %s1631_s21 = smov 127   ;;  %v1632_v2 = vmov 0.0   ;;  %vm1633_vm0 = vmmov 0   ;;  %s1867_s0 = inlined_call_operand.vmem [shape: f32[1,1,8,162], index: 0, kind: input, shape index: {}]   ;;  %s1868_s1 = inlined_call_operand.vmem [shape: f32[16,8,8], index: 1, kind: input, shape index: {}]   ;;  %s1869_s2 = inlined_call_operand.vmem [shape: f32[8,1], index: 2, kind: input, shape index: {}]   ;;  %s1870_s3 = inlined_call_operand.hbm [shape: f32[1,1,4,8,128], index: 3, kind: output, shape index: {0}]   ;;  %s1871_s4 = inlined_call_operand.vmem [shape: f32[1,8,1], index: 4, kind: output, shape index: {1}]   ;;  %s1872_s5 = inlined_call_operand.vmem [shape: f32[1,8,1], index: 5, kind: output, shape index: {2}]  }
   0x1   :  { %v27_v0 = vld [vmem:[%s1867_s0] sm:$0xff]  ;;  %v30_v1 = vld [vmem:[%s1867_s0 + $0x8] sm:$0xff]  ;;  %1511 = vmatprep.subr.mxu0 %v1632_v2  ;;  %1513 = vmatprep.mubr.msk.f32.mxu0 %vm1633_vm0, %v1632_v2 }
   0x2   :  { %189 = vrot.lane.b32.xlu1 %v27_v0, %s1630_s20  ;;  %33 = vrot.lane.b32.xlu0 %v27_v0, %s1631_s21  ;;  %v26_v3 = vld [vmem:[%s1868_s1] sm:$0xff] }
   0x3   :  { %1516 = vmatprep.subr.mxu1 %v1632_v2  ;;  %1518 = vmatprep.mubr.msk.f32.mxu1 %vm1633_vm0, %v1632_v2 }
   0x4   :  { %11 = vsyncpa [#allocation3], 0  ;;  %1517 = vmatpush3.msra.mxu1 %v27_v0  ;;  %vm40_vm1 = vcmask 64512   ;;  %s1634_s0 = smov 111   ;;  %s1635_s26 = smov 126   ;;  %v1639_v4 = vmov 0  }
   0x5   :  { %1526 = vmatprep.subr.mxu1 %v1632_v2  ;;  %1519 = vmatmul.mubr.msk.f32.vlgmr.msra.gmra.mrb[0].mxu1 %vm40_vm1, %v26_v3  ;;  %s1636_s27 = smov 110   ;;  %s1637_s28 = smov 96   ;;  %v25_v5 = vld [vmem:[%s1869_s2] sm:$0xff]  ;;  %vm37_vm2 = vcmask 1039360   ;;  %vm193_vm3 = vcmask 916480   ;;  %v1448_v10 = vld [vmem:[%s1868_s1 + $0x8] sm:$0xff] }
   0x6   :  { %191 = vrot.lane.b32.xlu1 %v30_v1, %s1630_s20  ;;  %35 = vrot.lane.b32.xlu0 %v30_v1, %s1631_s21  ;;  %s1638_s29 = smov 95   ;;  %s1640_s30 = smov 94   ;;  %vm276_vm4 = vcmask 908288   ;;  %v1451_v15 = vld [vmem:[%s1868_s1 + $0x10] sm:$0xff]  ;;  %v1453_v17 = vld [vmem:[%s1868_s1 + $0x18] sm:$0xff]  ;;  %vm398_vm5 = vcmask 1031168  }
   0x7   :  { %1528 = vmatprep.mubr.msk.f32.mxu1 %vm1633_vm0, %v1632_v2  ;;  %1605 = vset.pattern.permute.xlu0 %v1639_v4  ;;  %v1456_v20 = vld [vmem:[%s1868_s1 + $0x28] sm:$0xff]  ;;  %v1455_v24 = vld [vmem:[%s1868_s1 + $0x20] sm:$0xff]  ;;  %v1459_v28 = vld [vmem:[%s1868_s1 + $0x30] sm:$0xff]  ;;  %vm641_vm6 = vcmask 900096   ;;  %vm902_vm7 = vcmask 785408   ;;  %vm985_vm8 = vcmask 777216  }
   0x8   :  { %v1461_v32 = vld [vmem:[%s1868_s1 + $0x38] sm:$0xff]  ;;  %v1464_v36 = vld [vmem:[%s1868_s1 + $0x48] sm:$0xff]  ;;  %v1463_v40 = vld [vmem:[%s1868_s1 + $0x40] sm:$0xff]  ;;  %vm1328_vm9 = vcmask 769024   ;;  %vm22_vm11 = vcmask 7168   ;;  %s1641_s13 = smov [#allocation2]  }
   0x9   :  { %v1467_v44 = vld [vmem:[%s1868_s1 + $0x50] sm:$0xff]  ;;  %v1469_v48 = vld [vmem:[%s1868_s1 + $0x58] sm:$0xff]  ;;  %v1472_v52 = vld [vmem:[%s1868_s1 + $0x68] sm:$0xff]  ;;  %23 = vst.msk [vmem:[%s1871_s4] sm:$0xff] %vm22_vm11, %v1632_v2  ;;  %s1429_s14 = sshll.u32 %s1641_s13, 4  ;;  %s1430_s14 = int_to_ptr.vmem [resolvable:$true] %s1429_s14 }
   0xa   :  { %274 = vrot.lane.b32.xlu1 %v30_v1, %s1634_s0  ;;  %272 = vrot.lane.b32.xlu0 %v27_v0, %s1634_s0  ;;  %v1471_v56 = vld [vmem:[%s1868_s1 + $0x60] sm:$0xff]  ;;  %v1475_v60 = vld [vmem:[%s1868_s1 + $0x70] sm:$0xff]  ;;  %s1606_s15 = scalar_lea.vmem %s1430_s14, 512  ;;  %p1611_p1 = scmp.lt.s32.totalorder %s1430_s14, %s1430_s14 }
   0xb   :  { %24 = vst.msk [vmem:[%s1872_s5] sm:$0xff] %vm22_vm11, %v1632_v2  ;;  %p1607_p0 = scmp.ne.s32.totalorder %s1430_s14, %s1606_s15  ;;  %p1612_p2 = scmp.lt.s32.totalorder %s1606_s15, %s1606_s15 }
   0xd   :  { %p1613_p3 = por %p1612_p2, %p1611_p1 }
   0xe   :  { %396 = vrot.lane.b32.xlu1 %v30_v1, %s1635_s26  ;;  %394 = vrot.lane.b32.xlu0 %v27_v0, %s1635_s26 }
   0xf   :  { %p1614_p4 = pnand %p1613_p3, %p1607_p0 }
  0x12   :  { %476 = vrot.lane.b32.xlu1 %v30_v1, %s1631_s21  ;;  %474 = vrot.lane.b32.xlu0 %v27_v0, %s1631_s21 }
  0x16   :  { %557 = vrot.lane.b32.xlu1 %v30_v1, %s1634_s0  ;;  %555 = vrot.lane.b32.xlu0 %v27_v0, %s1634_s0 }
  0x1a   :  { %639 = vrot.lane.b32.xlu1 %v30_v1, %s1636_s27  ;;  %637 = vrot.lane.b32.xlu0 %v27_v0, %s1636_s27 }
  0x1e   :  { %740 = vrot.lane.b32.xlu1 %v30_v1, %s1634_s0  ;;  %738 = vrot.lane.b32.xlu0 %v27_v0, %s1634_s0 }
  0x22   :  { %819 = vrot.lane.b32.xlu1 %v30_v1, %s1630_s20  ;;  %817 = vrot.lane.b32.xlu0 %v27_v0, %s1630_s20 }
  0x26   :  { %900 = vrot.lane.b32.xlu1 %v30_v1, %s1637_s28  ;;  %898 = vrot.lane.b32.xlu0 %v27_v0, %s1637_s28 }
  0x2a   :  { %983 = vrot.lane.b32.xlu1 %v30_v1, %s1638_s29  ;;  %981 = vrot.lane.b32.xlu0 %v27_v0, %s1638_s29 }
  0x2e   :  { %1084 = vrot.lane.b32.xlu1 %v30_v1, %s1636_s27  ;;  %1082 = vrot.lane.b32.xlu0 %v27_v0, %s1636_s27 }
  0x32   :  { %1163 = vrot.lane.b32.xlu1 %v30_v1, %s1634_s0  ;;  %1161 = vrot.lane.b32.xlu0 %v27_v0, %s1634_s0 }
  0x36   :  { %1244 = vrot.lane.b32.xlu1 %v30_v1, %s1638_s29  ;;  %1242 = vrot.lane.b32.xlu0 %v27_v0, %s1638_s29 }
  0x3a   :  { %1326 = vrot.lane.b32.xlu1 %v30_v1, %s1640_s30  ;;  %1324 = vrot.lane.b32.xlu0 %v27_v0, %s1640_s30  ;;  %v1477_v0 = vld [vmem:[%s1868_s1 + $0x78] sm:$0xff] }
  0x3e   :  { %355 = vperm.xlu0 %1605, %v25_v5   ;;  %v360_v5 = vlaneseq }
  0x74   :  { %v190_v6 = vpop.permute.xlu1 %189  ;;  %v34_v7 = vpop.permute.xlu0 %33 }
  0x78   :  { %v192_v8 = vpop.permute.xlu1 %191  ;;  %v36_v9 = vpop.permute.xlu0 %35 }
  0x79   :  { %v38_v11 = vsel %vm37_vm2, %v34_v7, %v36_v9  ;;  %v194_v12 = vsel %vm193_vm3, %v190_v6, %v192_v8  ;;  %v361_v7 = vand.u32 127, %v360_v5 }
  0x7a   :  { %1512 = vmatpush3.msra.mxu0 %v38_v11 }
  0x7b   :  { %1521 = vmatprep.subr.mxu0 %v1632_v2  ;;  %1514 = vmatmul.mubr.msk.f32.vlgmr.msra.gmra.mrb[0].mxu0 %vm40_vm1, %v1448_v10  ;;  %v366_v11 = vand.u32 15, %v361_v7 }
  0x7c   :  { %v275_v13 = vpop.permute.xlu1 %274  ;;  %v273_v14 = vpop.permute.xlu0 %272  ;;  %1522 = vmatpush3.msra.mxu0 %v194_v12  ;;  %1523 = vmatprep.mubr.msk.f32.mxu0 %vm1633_vm0, %v1632_v2 }
  0x7d   :  { %v277_v16 = vsel %vm276_vm4, %v273_v14, %v275_v13  ;;  %1531 = vmatprep.subr.mxu0 %v1632_v2  ;;  %vm1811_vm10 = vcmp.lt.s32.totalorder %v366_v11, 8 }
  0x7e   :  { %1527 = vmatpush3.msra.mxu1 %v277_v16 }
  0x7f   :  { %1524 = vmatmul.mubr.msk.f32.vlgmr.msra.gmra.mrb[2].mxu0 %vm40_vm1, %v1451_v15  ;;  %1536 = vmatprep.subr.mxu1 %v1632_v2 }
  0x80   :  { %v397_v18 = vpop.permute.xlu1 %396  ;;  %v395_v19 = vpop.permute.xlu0 %394  ;;  %1529 = vmatmul.mubr.msk.f32.vlgmr.msra.gmra.mrb[2].mxu1 %vm40_vm1, %v1453_v17  ;;  %1533 = vmatprep.mubr.msk.f32.mxu0 %vm1633_vm0, %v1632_v2 }
  0x81   :  { %v399_v21 = vsel %vm398_vm5, %v395_v19, %v397_v18  ;;  %1538 = vmatprep.mubr.msk.f32.mxu1 %vm1633_vm0, %v1632_v2 }
  0x82   :  { %1532 = vmatpush3.msra.mxu0 %v399_v21 }
  0x83   :  { %1541 = vmatprep.subr.mxu0 %v1632_v2  ;;  %1534 = vmatmul.mubr.msk.f32.vlgmr.msra.gmra.mrb[4].mxu0 %vm40_vm1, %v1456_v20 }
  0x84   :  { %v477_v22 = vpop.permute.xlu1 %476  ;;  %v475_v23 = vpop.permute.xlu0 %474  ;;  %1543 = vmatprep.mubr.msk.f32.mxu0 %vm1633_vm0, %v1632_v2 }
  0x85   :  { %v478_v25 = vsel %vm37_vm2, %v475_v23, %v477_v22 }
  0x86   :  { %1537 = vmatpush3.msra.mxu1 %v478_v25 }
  0x87   :  { %1546 = vmatprep.subr.mxu1 %v1632_v2  ;;  %1539 = vmatmul.mubr.msk.f32.vlgmr.msra.gmra.mrb[4].mxu1 %vm40_vm1, %v1455_v24 }
  0x88   :  { %v558_v26 = vpop.permute.xlu1 %557  ;;  %v556_v27 = vpop.permute.xlu0 %555  ;;  %1548 = vmatprep.mubr.msk.f32.mxu1 %vm1633_vm0, %v1632_v2 }
  0x89   :  { %v559_v29 = vsel %vm276_vm4, %v556_v27, %v558_v26 }
  0x8a   :  { %1542 = vmatpush3.msra.mxu0 %v559_v29 }
  0x8b   :  { %1551 = vmatprep.subr.mxu0 %v1632_v2  ;;  %1544 = vmatmul.mubr.msk.f32.vlgmr.msra.gmra.mrb[6].mxu0 %vm40_vm1, %v1459_v28 }
  0x8c   :  { %v640_v30 = vpop.permute.xlu1 %639  ;;  %v638_v31 = vpop.permute.xlu0 %637  ;;  %1553 = vmatprep.mubr.msk.f32.mxu0 %vm1633_vm0, %v1632_v2 }
  0x8d   :  { %v642_v33 = vsel %vm641_vm6, %v638_v31, %v640_v30 }
  0x8e   :  { %1547 = vmatpush3.msra.mxu1 %v642_v33 }
  0x8f   :  { %1556 = vmatprep.subr.mxu1 %v1632_v2  ;;  %1549 = vmatmul.mubr.msk.f32.vlgmr.msra.gmra.mrb[6].mxu1 %vm40_vm1, %v1461_v32 }
  0x90   :  { %v741_v34 = vpop.permute.xlu1 %740  ;;  %v739_v35 = vpop.permute.xlu0 %738  ;;  %1558 = vmatprep.mubr.msk.f32.mxu1 %vm1633_vm0, %v1632_v2 }
  0x91   :  { %v742_v37 = vsel %vm276_vm4, %v739_v35, %v741_v34 }
  0x92   :  { %1552 = vmatpush3.msra.mxu0 %v742_v37 }
  0x93   :  { %1554 = vmatmul.mubr.msk.f32.vlgmr.msra.gmra.mrb[8].mxu0 %vm40_vm1, %v1464_v36  ;;  %1561 = vmatprep.subr.mxu0 %v1632_v2 }
  0x94   :  { %v820_v38 = vpop.permute.xlu1 %819  ;;  %v818_v39 = vpop.permute.xlu0 %817  ;;  %1563 = vmatprep.mubr.msk.f32.mxu0 %vm1633_vm0, %v1632_v2 }
  0x95   :  { %v821_v41 = vsel %vm193_vm3, %v818_v39, %v820_v38 }
  0x96   :  { %1557 = vmatpush3.msra.mxu1 %v821_v41 }
  0x97   :  { %1559 = vmatmul.mubr.msk.f32.vlgmr.msra.gmra.mrb[8].mxu1 %vm40_vm1, %v1463_v40  ;;  %1566 = vmatprep.subr.mxu1 %v1632_v2 }
  0x98   :  { %v901_v42 = vpop.permute.xlu1 %900  ;;  %v899_v43 = vpop.permute.xlu0 %898  ;;  %1568 = vmatprep.mubr.msk.f32.mxu1 %vm1633_vm0, %v1632_v2 }
  0x99   :  { %v903_v45 = vsel %vm902_vm7, %v899_v43, %v901_v42 }
  0x9a   :  { %1562 = vmatpush3.msra.mxu0 %v903_v45 }
  0x9b   :  { %1564 = vmatmul.mubr.msk.f32.vlgmr.msra.gmra.mrb[10].mxu0 %vm40_vm1, %v1467_v44  ;;  %1571 = vmatprep.subr.mxu0 %v1632_v2 }
  0x9c   :  { %v984_v46 = vpop.permute.xlu1 %983  ;;  %v982_v47 = vpop.permute.xlu0 %981  ;;  %1573 = vmatprep.mubr.msk.f32.mxu0 %vm1633_vm0, %v1632_v2 }
  0x9d   :  { %v986_v49 = vsel %vm985_vm8, %v982_v47, %v984_v46 }
  0x9e   :  { %1567 = vmatpush3.msra.mxu1 %v986_v49 }
  0x9f   :  { %1569 = vmatmul.mubr.msk.f32.vlgmr.msra.gmra.mrb[10].mxu1 %vm40_vm1, %v1469_v48  ;;  %1576 = vmatprep.subr.mxu1 %v1632_v2 }
  0xa0   :  { %v1085_v50 = vpop.permute.xlu1 %1084  ;;  %v1083_v51 = vpop.permute.xlu0 %1082  ;;  %1578 = vmatprep.mubr.msk.f32.mxu1 %vm1633_vm0, %v1632_v2 }
  0xa1   :  { %v1086_v53 = vsel %vm641_vm6, %v1083_v51, %v1085_v50 }
  0xa2   :  { %1572 = vmatpush3.msra.mxu0 %v1086_v53 }
  0xa3   :  { %1574 = vmatmul.mubr.msk.f32.vlgmr.msra.gmra.mrb[12].mxu0 %vm40_vm1, %v1472_v52  ;;  %1581 = vmatprep.subr.mxu0 %v1632_v2 }
  0xa4   :  { %v1164_v54 = vpop.permute.xlu1 %1163  ;;  %v1162_v55 = vpop.permute.xlu0 %1161  ;;  %1583 = vmatprep.mubr.msk.f32.mxu0 %vm1633_vm0, %v1632_v2 }
  0xa5   :  { %v1165_v57 = vsel %vm276_vm4, %v1162_v55, %v1164_v54 }
  0xa6   :  { %1577 = vmatpush3.msra.mxu1 %v1165_v57 }
  0xa7   :  { %1579 = vmatmul.mubr.msk.f32.vlgmr.msra.gmra.mrb[12].mxu1 %vm40_vm1, %v1471_v56  ;;  %1586 = vmatprep.subr.mxu1 %v1632_v2 }
  0xa8   :  { %v1245_v58 = vpop.permute.xlu1 %1244  ;;  %v1243_v59 = vpop.permute.xlu0 %1242  ;;  %1588 = vmatprep.mubr.msk.f32.mxu1 %vm1633_vm0, %v1632_v2 }
  0xa9   :  { %v1246_v61 = vsel %vm985_vm8, %v1243_v59, %v1245_v58 }
  0xaa   :  { %1582 = vmatpush3.msra.mxu0 %v1246_v61 }
  0xab   :  { %1584 = vmatmul.mubr.msk.f32.vlgmr.msra.gmra.mrb[14].mxu0 %vm40_vm1, %v1475_v60 }
  0xac   :  { %v1327_v62 = vpop.permute.xlu1 %1326  ;;  %v1325_v63 = vpop.permute.xlu0 %1324 }
  0xad   :  { %v1329_v1 = vsel %vm1328_vm9, %v1325_v63, %v1327_v62 }
  0xae   :  { %1587 = vmatpush3.msra.mxu1 %v1329_v1 }
  0xaf   :  { %1589 = vmatmul.mubr.msk.f32.vlgmr.msra.gmra.mrb[14].mxu1 %vm40_vm1, %v1477_v0 }
  0xbd   :  { %v356_v16 = vpop.permute.xlu0 %355 }
  0xd8   :  { %v183_v3 = vpop.f32.mrb[0].mxu1 }
  0xd9   :  { %v1520_v4 = vpop.f32.mrb[1].mxu1 }
 0x14e   :  { %v110_v6 = vpop.f32.mrb[0].mxu0 }
 0x14f   :  { %v184_v8 = vadd.f32 %v183_v3, %v110_v6  ;;  %v1515_v9 = vpop.f32.mrb[1].mxu0 }
 0x152   :  { %v265_v10 = vpop.f32.mrb[2].mxu0 }
 0x153   :  { %v269_v12 = vadd.f32 %v265_v10, %v184_v8  ;;  %v348_v13 = vpop.f32.mrb[2].mxu1  ;;  %v1525_v14 = vpop.f32.mrb[3].mxu0 }
 0x154   :  { %v1530_v15 = vpop.f32.mrb[3].mxu1 }
 0x155   :  { %v352_v17 = vadd.f32 %v348_v13, %v269_v12 }
 0x156   :  { %v470_v18 = vpop.f32.mrb[4].mxu0 }
 0x157   :  { %v1535_v20 = vpop.f32.mrb[5].mxu0  ;;  %v358_v21 = vadd.f32 %v356_v16, %v352_v17 }
 0x159   :  { %v377_v22 = vsel %vm1811_vm10, %v358_v21, 0.0  ;;  %359 = vst [vmem:[#allocation2] sm:$0xff] %v358_v21  ;;  %v381_v23 = vmul.f32 %v358_v21, %v358_v21 }
 0x15a   :  { %v549_v24 = vpop.f32.mrb[4].mxu1  ;;  %378 = vadd.xlane.f32.xlu1 %v377_v22 }
 0x15b   :  { %v550_v25 = vadd.f32 %v549_v24, %v470_v18  ;;  %v1540_v26 = vpop.f32.mrb[5].mxu1  ;;  %v382_v27 = vsel %vm1811_vm10, %v381_v23, 0.0 }
 0x15c   :  { %383 = vadd.xlane.f32.xlu0 %v382_v27 }
 0x15e   :  { %v630_v28 = vpop.f32.mrb[6].mxu0 }
 0x15f   :  { %v634_v29 = vadd.f32 %v630_v28, %v550_v25  ;;  %v1545_v30 = vpop.f32.mrb[7].mxu0 }
 0x162   :  { %v713_v31 = vpop.f32.mrb[6].mxu1 }
 0x163   :  { %v717_v32 = vadd.f32 %v713_v31, %v634_v29  ;;  %v1550_v33 = vpop.f32.mrb[7].mxu1 }
 0x165   :  { %v718_v34 = vadd.f32 %v717_v32, %v356_v16 }
 0x166   :  { %v813_v35 = vpop.f32.mrb[8].mxu0 }
 0x167   :  { %720 = vst [vmem:[#allocation2 + $0x8] sm:$0xff] %v718_v34  ;;  %v1555_v36 = vpop.f32.mrb[9].mxu0  ;;  %v721_v37 = vsel %vm1811_vm10, %v718_v34, 0.0  ;;  %v725_v38 = vmul.f32 %v718_v34, %v718_v34 }
 0x168   :  { %722 = vadd.xlane.f32.xlu1 %v721_v37 }
 0x169   :  { %v726_v39 = vsel %vm1811_vm10, %v725_v38, 0.0 }
 0x16a   :  { %v892_v40 = vpop.f32.mrb[8].mxu1  ;;  %727 = vadd.xlane.f32.xlu0 %v726_v39 }
 0x16b   :  { %v893_v41 = vadd.f32 %v892_v40, %v813_v35  ;;  %v1560_v42 = vpop.f32.mrb[9].mxu1 }
 0x16e   :  { %v974_v43 = vpop.f32.mrb[10].mxu0 }
 0x16f   :  { %v978_v44 = vadd.f32 %v974_v43, %v893_v41  ;;  %v1565_v45 = vpop.f32.mrb[11].mxu0 }
 0x172   :  { %v1057_v46 = vpop.f32.mrb[10].mxu1 }
 0x173   :  { %v1061_v47 = vadd.f32 %v1057_v46, %v978_v44  ;;  %v1570_v48 = vpop.f32.mrb[11].mxu1 }
 0x175   :  { %v1062_v49 = vadd.f32 %v1061_v47, %v356_v16 }
 0x176   :  { %v1157_v50 = vpop.f32.mrb[12].mxu0 }
 0x177   :  { %1064 = vst [vmem:[#allocation2 + $0x10] sm:$0xff] %v1062_v49  ;;  %v1065_v51 = vsel %vm1811_vm10, %v1062_v49, 0.0  ;;  %v1069_v52 = vmul.f32 %v1062_v49, %v1062_v49  ;;  %v1575_v53 = vpop.f32.mrb[13].mxu0 }
 0x178   :  { %1066 = vadd.xlane.f32.xlu1 %v1065_v51 }
 0x179   :  { %v1070_v54 = vsel %vm1811_vm10, %v1069_v52, 0.0 }
 0x17a   :  { %1071 = vadd.xlane.f32.xlu0 %v1070_v54  ;;  %v1236_v55 = vpop.f32.mrb[12].mxu1 }
 0x17b   :  { %v1237_v56 = vadd.f32 %v1236_v55, %v1157_v50  ;;  %v1580_v57 = vpop.f32.mrb[13].mxu1 }
 0x17e   :  { %v1317_v58 = vpop.f32.mrb[14].mxu0 }
 0x17f   :  { %v1321_v59 = vadd.f32 %v1317_v58, %v1237_v56  ;;  %v1585_v60 = vpop.f32.mrb[15].mxu0 }
 0x182   :  { %v1400_v61 = vpop.f32.mrb[14].mxu1 }
 0x183   :  { %v1404_v62 = vadd.f32 %v1400_v61, %v1321_v59  ;;  %v1590_v63 = vpop.f32.mrb[15].mxu1 }
 0x185   :  { %v1405_v0 = vadd.f32 %v1404_v62, %v356_v16 }
 0x187   :  { %1407 = vst [vmem:[#allocation2 + $0x18] sm:$0xff] %v1405_v0  ;;  %v1408_v1 = vsel %vm1811_vm10, %v1405_v0, 0.0  ;;  %v1412_v3 = vmul.f32 %v1405_v0, %v1405_v0 }
 0x188   :  { %1409 = vadd.xlane.f32.xlu1 %v1408_v1 }
 0x189   :  { %v1413_v4 = vsel %vm1811_vm10, %v1412_v3, 0.0 }
 0x18a   :  { %1414 = vadd.xlane.f32.xlu0 %v1413_v4 }
 0x18b   :  { %1617 = shalt.err (!%p1614_p4)
}
 0x18c   :  { %s1618_s18 = scalar_lea.hbm %s1870_s3, 512 }
 0x18d   :  { %p1619_p5 = scmp.ne.s32.totalorder %s1870_s3, %s1618_s18  ;;  %p1622_p6 = scmp.lt.u32.totalorder %s1618_s18, %s1870_s3 }
 0x18f   :  { %p1624_p7 = pnand %p1622_p6, %p1619_p5 }
 0x191   :  { %1627 = shalt.err (!%p1624_p7)
}
 0x192   :  { %s1642_s23 = smov 128   ;;  %s1643_s24 = smov 8   ;;  %v1417_v14 = vld [vmem:[%s1871_s4] sm:$0xff] }
 0x193   :  { %1435 = dma.vmem_to_hbm [thread:$0]  %s1430_s14, 512, %s1870_s3, [#allocation3], %s1642_s23, %s1642_s23, %s1643_s24  }
 0x194   :  { %v1421_v18 = vld [vmem:[%s1872_s5] sm:$0xff] }
 0x1e7   :  { %v379_v2 = vpop.xlane.xlu1 %378 }
 0x1e9   :  { %v384_v5 = vpop.xlane.xlu0 %383 }
 0x1f5   :  { %v723_v6 = vpop.xlane.xlu1 %722 }
 0x1f6   :  { %v724_v9 = vadd.f32 %v723_v6, %v379_v2 }
 0x1f7   :  { %v728_v7 = vpop.xlane.xlu0 %727 }
 0x1f8   :  { %v729_v11 = vadd.f32 %v728_v7, %v384_v5 }
 0x205   :  { %v1067_v8 = vpop.xlane.xlu1 %1066 }
 0x206   :  { %v1068_v12 = vadd.f32 %v1067_v8, %v724_v9 }
 0x207   :  { %v1072_v10 = vpop.xlane.xlu0 %1071 }
 0x208   :  { %v1073_v15 = vadd.f32 %v1072_v10, %v729_v11 }
 0x215   :  { %v1410_v13 = vpop.xlane.xlu1 %1409 }
 0x216   :  { %v1411_v16 = vadd.f32 %v1410_v13, %v1068_v12 }
 0x217   :  { %v1415_v17 = vpop.xlane.xlu0 %1414 }
 0x218   :  { %v1418_v19 = vadd.f32 %v1417_v14, %v1411_v16  ;;  %v1416_v20 = vadd.f32 %v1415_v17, %v1073_v15 }
 0x21a   :  { %1420 = vst.msk [vmem:[%s1871_s4] sm:$0xff] %vm22_vm11, %v1418_v19  ;;  %v1422_v21 = vadd.f32 %v1421_v18, %v1416_v20 }
 0x21c   :  { %1423 = vst.msk [vmem:[%s1872_s5] sm:$0xff] %vm22_vm11, %v1422_v21 }
 0x21d   :  { %1628 = dma.done.wait [#allocation3], 512  }
 0x21e   :  { %1629 = vsyncadd [#allocation3], 4294966784 }
 0x21f   :  { %1447 = vsyncpa [#allocation3], 1 }

</bundles_post_ra>
